<compile_context>
chip_gen: v6e
topology: v6e:2x2x1
jax: 0.10.0
libtpu: 0.0.40
codegen_flags: <defaults>
</compile_context>

<pallas_src>
import functools

import jax
import jax.numpy as jnp
import numpy as np
from jax.experimental import pallas as pl
from jax.experimental.pallas import tpu as pltpu


def _pick_tile_h(H, W, N, frame_isize, core_isize, budget_bytes):
    """Largest H-tile (multiple of 8, dividing H) whose working set fits budget."""
    if H % 8 != 0:
        return H                                   # single full-H tile fallback
    candidates = [th for th in range(8, H + 1, 8) if H % th == 0]
    best = candidates[0]
    for th in candidates:
        core_blk = N * 9 * th * W * core_isize
        frame_blk = N * (th + 16) * W * frame_isize    # tile + two 8-row halo windows
        out_blk = (N + 1) * th * W * 4
        interim = 6 * N * th * W * 4                   # in-register shifted taps + acc
        if 2 * (core_blk + frame_blk + out_blk) + interim <= budget_bytes:
            best = th
    return best


def _kpn_kernel(f_ref, ftop_ref, fbot_ref, core_ref, p_ref, pi_ref, *,
                K, inv_wl, n_htiles):
    # f_ref    : (1, N, TH, W)       frame rows of this tile (native dtype)
    # ftop_ref : (1, N, HB, W)       window ending just above the tile (edge-clamped)
    # fbot_ref : (1, N, HB, W)       window starting just below the tile (edge-clamped)
    # core_ref : (1, N, K*K, TH, W)  per-pixel filter taps
    # p_ref    : (1, 1, TH, W)       mean-over-N prediction
    # pi_ref   : (1, N, 1, TH, W)    per-frame prediction
    h = pl.program_id(1)

    f = f_ref[0].astype(jnp.float32)          # single load; all shifts are in-register
    cr = core_ref[0].astype(jnp.float32)      # (N, K*K, TH, W)
    N, TH, W = f.shape
    HB = ftop_ref.shape[2]

    # 1-row halos with zero-pad semantics at the image boundary.
    top = jnp.where(h > 0, ftop_ref[0, :, HB - 1:HB, :].astype(jnp.float32), 0.0)
    bot = jnp.where(h < n_htiles - 1, fbot_ref[0, :, 0:1, :].astype(jnp.float32), 0.0)

    # Sublane (H) shifts: frame[y-1], frame[y], frame[y+1]  (index i <-> y + i - 1).
    f_up = jnp.concatenate([top, f[:, :TH - 1, :]], axis=1)
    f_dn = jnp.concatenate([f[:, 1:, :], bot], axis=1)
    bases = (f_up, f, f_dn)

    zcol = jnp.zeros((N, TH, 1), jnp.float32)
    acc = jnp.zeros((N, TH, W), jnp.float32)
    for i in range(K):
        base = bases[i]
        for j in range(K):
            dj = j - K // 2
            if dj == 0:
                s = base
            elif dj < 0:                       # frame[x-1], zero at x=0
                s = jnp.concatenate([zcol, base[:, :, :W - 1]], axis=2)
            else:                              # frame[x+1], zero at x=W-1
                s = jnp.concatenate([base[:, :, 1:], zcol], axis=2)
            acc = acc + cr[:, i * K + j] * s

    pi = acc * inv_wl                          # (N, TH, W) f32
    pi_ref[0, :, 0] = pi.astype(pi_ref.dtype)
    p_ref[0, 0] = jnp.mean(pi, axis=0).astype(p_ref.dtype)


def kernel_conv_forward(frames, core, kernel_size=3, white_level=1.0, tile_h=None):
    """Pallas implementation of KernelConv.forward (gray input, single kernel size)."""
    # TODO(synk): sep_conv / core_bias / multi-kernel-size / 5-D color paths of the
    # torch module are not implemented (module defaults only).
    B, N, H, W = frames.shape
    K = kernel_size
    assert K == 3, "Pallas kernel implements the module's default kernel_size=[3]"
    C = 1

    # Metadata-only reshape (no HBM pass); dtype stays native, cast happens in-kernel.
    core_r = core.reshape(B, N, K * K, H, W)
    out_dtype = jnp.promote_types(frames.dtype, core.dtype)

    if tile_h is None:
        tile_h = _pick_tile_h(H, W, N, frames.dtype.itemsize, core.dtype.itemsize,
                              budget_bytes=20 * 1024 * 1024)
    TH = tile_h
    assert H % TH == 0 and (TH % 8 == 0 or TH == H)
    HT = H // TH
    HB = 8 if H % 8 == 0 else H            # halo-window height (mult. of 8 or full H)
    R = TH // HB                           # H-tile size in halo-window units
    NHB = H // HB                          # number of halo-window blocks along H

    grid = (B, HT)
    in_specs = [
        pl.BlockSpec((1, N, TH, W), lambda b, h: (b, 0, h, 0)),
        pl.BlockSpec((1, N, HB, W),
                     lambda b, h: (b, 0, jnp.maximum(h * R - 1, 0), 0)),
        pl.BlockSpec((1, N, HB, W),
                     lambda b, h: (b, 0, jnp.minimum(h * R + R, NHB - 1), 0)),
        pl.BlockSpec((1, N, K * K, TH, W), lambda b, h: (b, 0, 0, h, 0)),
    ]
    out_specs = [
        pl.BlockSpec((1, C, TH, W), lambda b, h: (b, 0, h, 0)),
        pl.BlockSpec((1, N, C, TH, W), lambda b, h: (b, 0, 0, h, 0)),
    ]

    flops = 2 * K * K * B * N * H * W + B * N * H * W
    bytes_accessed = int(
        frames.size * frames.dtype.itemsize * (1.0 + 2.0 * HB / H)
        + core.size * core.dtype.itemsize
        + (B * N + B) * C * H * W * jnp.dtype(out_dtype).itemsize)

    kern = functools.partial(_kpn_kernel, K=K, inv_wl=1.0 / float(white_level),
                             n_htiles=HT)
    pred_img, pred_img_i = pl.pallas_call(
        kern,
        grid_spec=pltpu.PrefetchScalarGridSpec(
            num_scalar_prefetch=0, grid=grid,
            in_specs=in_specs, out_specs=out_specs),
        out_shape=(
            jax.ShapeDtypeStruct((B, C, H, W), out_dtype),
            jax.ShapeDtypeStruct((B, N, C, H, W), out_dtype),
        ),
        compiler_params=pltpu.CompilerParams(
            dimension_semantics=("parallel", "parallel"),
            vmem_limit_bytes=32 * 1024 * 1024),
        cost_estimate=pl.CostEstimate(flops=int(flops), transcendentals=0,
                                      bytes_accessed=bytes_accessed),
    )(frames, frames, frames, core_r)
    return pred_img, pred_img_i


def reference_forward(frames, core, kernel_size=3, white_level=1.0):
    """Pure-JAX reference mirroring the PyTorch module."""
    B, N, H, W = frames.shape
    K = kernel_size
    pad = K // 2
    f = frames.reshape(B, N, 1, H, W).astype(jnp.float32)
    core_r = core.reshape(B, N, K * K, 1, H, W).astype(jnp.float32)
    fp = jnp.pad(f, ((0, 0), (0, 0), (0, 0), (pad, pad), (pad, pad)))
    stack = jnp.stack(
        [fp[..., i:i + H, j:j + W] for i in range(K) for j in range(K)], axis=2)
    pred_i = jnp.sum(core_r * stack, axis=2) / white_level
    pred = jnp.mean(pred_i, axis=1)
    return pred, pred_i


if __name__ == "__main__":
    K = 3
    k0, k1, k2, k3 = jax.random.split(jax.random.PRNGKey(0), 4)

    # Primary small test (matches the toy module shapes): single H-tile.
    B, N, H, W = 2, 4, 16, 16
    frames = jax.random.normal(k0, (B, N, H, W), dtype=jnp.float32)
    core = jax.random.normal(k1, (B, N * K * K, H, W), dtype=jnp.float32)
    pred_img, pred_img_i = kernel_conv_forward(frames, core, kernel_size=K,
                                               white_level=1.0)
    jax.block_until_ready((pred_img, pred_img_i))
    ref_p, ref_pi = reference_forward(frames, core, kernel_size=K, white_level=1.0)
    assert pred_img.shape == (B, 1, H, W)
    assert pred_img_i.shape == (B, N, 1, H, W)
    assert np.allclose(np.asarray(pred_img), np.asarray(ref_p), rtol=1e-5, atol=1e-5)
    assert np.allclose(np.asarray(pred_img_i), np.asarray(ref_pi), rtol=1e-5, atol=1e-5)

    # Second check exercising the multi-tile halo path (H split into two 16-row
    # tiles, lane-dense W=128), still small and deterministic.
    B2, N2, H2, W2 = 1, 2, 32, 128
    frames2 = jax.random.normal(k2, (B2, N2, H2, W2), dtype=jnp.float32)
    core2 = jax.random.normal(k3, (B2, N2 * K * K, H2, W2), dtype=jnp.float32)
    p2, pi2 = kernel_conv_forward(frames2, core2, kernel_size=K, white_level=1.0,
                                  tile_h=16)
    jax.block_until_ready((p2, pi2))
    rp2, rpi2 = reference_forward(frames2, core2, kernel_size=K, white_level=1.0)
    assert np.allclose(np.asarray(p2), np.asarray(rp2), rtol=1e-5, atol=1e-5)
    assert np.allclose(np.asarray(pi2), np.asarray(rpi2), rtol=1e-5, atol=1e-5)

    print("KERNEL_OK")
</pallas_src>

<mosaic_0001>
module attributes {stable_mosaic.version = 11 : i64} {
  func.func @_kpn_kernel(%arg0: i32, %arg1: i32, %arg2: memref<1x4x16x16xf32, #tpu.memory_space<vmem>>, %arg3: memref<1x4x8x16xf32, #tpu.memory_space<vmem>>, %arg4: memref<1x4x8x16xf32, #tpu.memory_space<vmem>>, %arg5: memref<1x4x9x16x16xf32, #tpu.memory_space<vmem>>, %arg6: memref<1x1x16x16xf32, #tpu.memory_space<vmem>>, %arg7: memref<1x4x1x16x16xf32, #tpu.memory_space<vmem>>) attributes {dimension_semantics = [#tpu.dimension_semantics<parallel>, #tpu.dimension_semantics<parallel>], iteration_bounds = array<i64: 2, 1>, scalar_prefetch = 0 : i64, scratch_operands = 0 : i64, tpu.core_type = #tpu.core_type<tc>, window_params = [{transform_indices = @transform_0, window_bounds = array<i64: 1, 4, 16, 16>}, {transform_indices = @transform_1, window_bounds = array<i64: 1, 4, 8, 16>}, {transform_indices = @transform_2, window_bounds = array<i64: 1, 4, 8, 16>}, {transform_indices = @transform_3, window_bounds = array<i64: 1, 4, 9, 16, 16>}, {transform_indices = @transform_4, window_bounds = array<i64: 1, 1, 16, 16>}, {transform_indices = @transform_5, window_bounds = array<i64: 1, 4, 1, 16, 16>}]} {
    %c0 = arith.constant 0 : index
    %c0_0 = arith.constant 0 : index
    %c0_1 = arith.constant 0 : index
    %c0_2 = arith.constant 0 : index
    %0 = vector.load %arg2[%c0, %c0_0, %c0_1, %c0_2] : memref<1x4x16x16xf32, #tpu.memory_space<vmem>>, vector<1x4x16x16xf32>
    %1 = vector.shape_cast %0 : vector<1x4x16x16xf32> to vector<4x16x16xf32>
    %c0_3 = arith.constant 0 : index
    %c0_4 = arith.constant 0 : index
    %c0_5 = arith.constant 0 : index
    %c0_6 = arith.constant 0 : index
    %c0_7 = arith.constant 0 : index
    %2 = vector.load %arg5[%c0_3, %c0_4, %c0_5, %c0_6, %c0_7] : memref<1x4x9x16x16xf32, #tpu.memory_space<vmem>>, vector<1x4x9x16x16xf32>
    %3 = vector.shape_cast %2 : vector<1x4x9x16x16xf32> to vector<4x9x16x16xf32>
    %c0_i32 = arith.constant 0 : i32
    %4 = arith.cmpi sgt, %arg1, %c0_i32 : i32
    %c0_8 = arith.constant 0 : index
    %c0_9 = arith.constant 0 : index
    %c7 = arith.constant 7 : index
    %c0_10 = arith.constant 0 : index
    %5 = vector.load %arg3[%c0_8, %c0_9, %c7, %c0_10] : memref<1x4x8x16xf32, #tpu.memory_space<vmem>>, vector<1x4x1x16xf32>
    %6 = vector.shape_cast %5 : vector<1x4x1x16xf32> to vector<4x1x16xf32>
    %cst = arith.constant 0.000000e+00 : f32
    %7 = vector.broadcast %cst : f32 to vector<4x1x16xf32>
    %8 = arith.select %4, %6, %7 : vector<4x1x16xf32>
    %c0_i32_11 = arith.constant 0 : i32
    %9 = arith.cmpi slt, %arg1, %c0_i32_11 : i32
    %c0_12 = arith.constant 0 : index
    %c0_13 = arith.constant 0 : index
    %c0_14 = arith.constant 0 : index
    %c0_15 = arith.constant 0 : index
    %10 = vector.load %arg4[%c0_12, %c0_13, %c0_14, %c0_15] : memref<1x4x8x16xf32, #tpu.memory_space<vmem>>, vector<1x4x1x16xf32>
    %11 = vector.shape_cast %10 : vector<1x4x1x16xf32> to vector<4x1x16xf32>
    %cst_16 = arith.constant 0.000000e+00 : f32
    %12 = vector.broadcast %cst_16 : f32 to vector<4x1x16xf32>
    %13 = arith.select %9, %11, %12 : vector<4x1x16xf32>
    %14 = vector.extract_strided_slice %1 {offsets = [0, 0, 0], sizes = [4, 15, 16], strides = [1, 1, 1]} : vector<4x16x16xf32> to vector<4x15x16xf32>
    %15 = tpu.concatenate %8, %14 in 1 : vector<4x1x16xf32>, vector<4x15x16xf32> -> vector<4x16x16xf32>
    %16 = vector.extract_strided_slice %1 {offsets = [0, 1, 0], sizes = [4, 15, 16], strides = [1, 1, 1]} : vector<4x16x16xf32> to vector<4x15x16xf32>
    %17 = tpu.concatenate %16, %13 in 1 : vector<4x15x16xf32>, vector<4x1x16xf32> -> vector<4x16x16xf32>
    %cst_17 = arith.constant 0.000000e+00 : f32
    %18 = vector.broadcast %cst_17 : f32 to vector<4x16x1xf32>
    %cst_18 = arith.constant 0.000000e+00 : f32
    %19 = vector.broadcast %cst_18 : f32 to vector<4x16x16xf32>
    %20 = vector.extract_strided_slice %15 {offsets = [0, 0, 0], sizes = [4, 16, 15], strides = [1, 1, 1]} : vector<4x16x16xf32> to vector<4x16x15xf32>
    %21 = tpu.concatenate %18, %20 in 2 : vector<4x16x1xf32>, vector<4x16x15xf32> -> vector<4x16x16xf32>
    %22 = vector.extract_strided_slice %3 {offsets = [0, 0, 0, 0], sizes = [4, 1, 16, 16], strides = [1, 1, 1, 1]} : vector<4x9x16x16xf32> to vector<4x1x16x16xf32>
    %23 = vector.shape_cast %22 : vector<4x1x16x16xf32> to vector<4x16x16xf32>
    %24 = arith.mulf %23, %21 : vector<4x16x16xf32>
    %25 = arith.addf %19, %24 : vector<4x16x16xf32>
    %26 = vector.extract_strided_slice %3 {offsets = [0, 1, 0, 0], sizes = [4, 1, 16, 16], strides = [1, 1, 1, 1]} : vector<4x9x16x16xf32> to vector<4x1x16x16xf32>
    %27 = vector.shape_cast %26 : vector<4x1x16x16xf32> to vector<4x16x16xf32>
    %28 = arith.mulf %27, %15 : vector<4x16x16xf32>
    %29 = arith.addf %25, %28 : vector<4x16x16xf32>
    %30 = vector.extract_strided_slice %15 {offsets = [0, 0, 1], sizes = [4, 16, 15], strides = [1, 1, 1]} : vector<4x16x16xf32> to vector<4x16x15xf32>
    %31 = tpu.concatenate %30, %18 in 2 : vector<4x16x15xf32>, vector<4x16x1xf32> -> vector<4x16x16xf32>
    %32 = vector.extract_strided_slice %3 {offsets = [0, 2, 0, 0], sizes = [4, 1, 16, 16], strides = [1, 1, 1, 1]} : vector<4x9x16x16xf32> to vector<4x1x16x16xf32>
    %33 = vector.shape_cast %32 : vector<4x1x16x16xf32> to vector<4x16x16xf32>
    %34 = arith.mulf %33, %31 : vector<4x16x16xf32>
    %35 = arith.addf %29, %34 : vector<4x16x16xf32>
    %36 = vector.extract_strided_slice %1 {offsets = [0, 0, 0], sizes = [4, 16, 15], strides = [1, 1, 1]} : vector<4x16x16xf32> to vector<4x16x15xf32>
    %37 = tpu.concatenate %18, %36 in 2 : vector<4x16x1xf32>, vector<4x16x15xf32> -> vector<4x16x16xf32>
    %38 = vector.extract_strided_slice %3 {offsets = [0, 3, 0, 0], sizes = [4, 1, 16, 16], strides = [1, 1, 1, 1]} : vector<4x9x16x16xf32> to vector<4x1x16x16xf32>
    %39 = vector.shape_cast %38 : vector<4x1x16x16xf32> to vector<4x16x16xf32>
    %40 = arith.mulf %39, %37 : vector<4x16x16xf32>
    %41 = arith.addf %35, %40 : vector<4x16x16xf32>
    %42 = vector.extract_strided_slice %3 {offsets = [0, 4, 0, 0], sizes = [4, 1, 16, 16], strides = [1, 1, 1, 1]} : vector<4x9x16x16xf32> to vector<4x1x16x16xf32>
    %43 = vector.shape_cast %42 : vector<4x1x16x16xf32> to vector<4x16x16xf32>
    %44 = arith.mulf %43, %1 : vector<4x16x16xf32>
    %45 = arith.addf %41, %44 : vector<4x16x16xf32>
    %46 = vector.extract_strided_slice %1 {offsets = [0, 0, 1], sizes = [4, 16, 15], strides = [1, 1, 1]} : vector<4x16x16xf32> to vector<4x16x15xf32>
    %47 = tpu.concatenate %46, %18 in 2 : vector<4x16x15xf32>, vector<4x16x1xf32> -> vector<4x16x16xf32>
    %48 = vector.extract_strided_slice %3 {offsets = [0, 5, 0, 0], sizes = [4, 1, 16, 16], strides = [1, 1, 1, 1]} : vector<4x9x16x16xf32> to vector<4x1x16x16xf32>
    %49 = vector.shape_cast %48 : vector<4x1x16x16xf32> to vector<4x16x16xf32>
    %50 = arith.mulf %49, %47 : vector<4x16x16xf32>
    %51 = arith.addf %45, %50 : vector<4x16x16xf32>
    %52 = vector.extract_strided_slice %17 {offsets = [0, 0, 0], sizes = [4, 16, 15], strides = [1, 1, 1]} : vector<4x16x16xf32> to vector<4x16x15xf32>
    %53 = tpu.concatenate %18, %52 in 2 : vector<4x16x1xf32>, vector<4x16x15xf32> -> vector<4x16x16xf32>
    %54 = vector.extract_strided_slice %3 {offsets = [0, 6, 0, 0], sizes = [4, 1, 16, 16], strides = [1, 1, 1, 1]} : vector<4x9x16x16xf32> to vector<4x1x16x16xf32>
    %55 = vector.shape_cast %54 : vector<4x1x16x16xf32> to vector<4x16x16xf32>
    %56 = arith.mulf %55, %53 : vector<4x16x16xf32>
    %57 = arith.addf %51, %56 : vector<4x16x16xf32>
    %58 = vector.extract_strided_slice %3 {offsets = [0, 7, 0, 0], sizes = [4, 1, 16, 16], strides = [1, 1, 1, 1]} : vector<4x9x16x16xf32> to vector<4x1x16x16xf32>
    %59 = vector.shape_cast %58 : vector<4x1x16x16xf32> to vector<4x16x16xf32>
    %60 = arith.mulf %59, %17 : vector<4x16x16xf32>
    %61 = arith.addf %57, %60 : vector<4x16x16xf32>
    %62 = vector.extract_strided_slice %17 {offsets = [0, 0, 1], sizes = [4, 16, 15], strides = [1, 1, 1]} : vector<4x16x16xf32> to vector<4x16x15xf32>
    %63 = tpu.concatenate %62, %18 in 2 : vector<4x16x15xf32>, vector<4x16x1xf32> -> vector<4x16x16xf32>
    %64 = vector.extract_strided_slice %3 {offsets = [0, 8, 0, 0], sizes = [4, 1, 16, 16], strides = [1, 1, 1, 1]} : vector<4x9x16x16xf32> to vector<4x1x16x16xf32>
    %65 = vector.shape_cast %64 : vector<4x1x16x16xf32> to vector<4x16x16xf32>
    %66 = arith.mulf %65, %63 : vector<4x16x16xf32>
    %67 = arith.addf %61, %66 : vector<4x16x16xf32>
    %cst_19 = arith.constant 1.000000e+00 : f32
    %68 = vector.broadcast %cst_19 : f32 to vector<4x16x16xf32>
    %69 = arith.mulf %67, %68 : vector<4x16x16xf32>
    %c0_20 = arith.constant 0 : index
    %c0_21 = arith.constant 0 : index
    %c0_22 = arith.constant 0 : index
    %c0_23 = arith.constant 0 : index
    %c0_24 = arith.constant 0 : index
    %70 = vector.load %arg7[%c0_20, %c0_21, %c0_22, %c0_23, %c0_24] : memref<1x4x1x16x16xf32, #tpu.memory_space<vmem>>, vector<1x4x1x16x16xf32>
    %71 = vector.shape_cast %70 : vector<1x4x1x16x16xf32> to vector<4x16x16xf32>
    %72 = vector.shape_cast %69 : vector<4x16x16xf32> to vector<1x4x1x16x16xf32>
    tpu.vector_store %arg7[%c0_20, %c0_21, %c0_22, %c0_23, %c0_24], %72 {strides = array<i32>} : memref<1x4x1x16x16xf32, #tpu.memory_space<vmem>>, vector<1x4x1x16x16xf32>,
    %cst_25 = arith.constant dense<0.000000e+00> : vector<16x16xf32>
    %73 = vector.multi_reduction <add>, %69, %cst_25 [0] : vector<4x16x16xf32> to vector<16x16xf32>
    %cst_26 = arith.constant 4.000000e+00 : f32
    %74 = vector.broadcast %cst_26 : f32 to vector<16x16xf32>
    %75 = arith.divf %73, %74 : vector<16x16xf32>
    %c0_27 = arith.constant 0 : index
    %c0_28 = arith.constant 0 : index
    %c0_29 = arith.constant 0 : index
    %c0_30 = arith.constant 0 : index
    %76 = vector.load %arg6[%c0_27, %c0_28, %c0_29, %c0_30] : memref<1x1x16x16xf32, #tpu.memory_space<vmem>>, vector<1x1x16x16xf32>
    %77 = vector.shape_cast %76 : vector<1x1x16x16xf32> to vector<16x16xf32>
    %78 = vector.shape_cast %75 : vector<16x16xf32> to vector<1x1x16x16xf32>
    tpu.vector_store %arg6[%c0_27, %c0_28, %c0_29, %c0_30], %78 {strides = array<i32>} : memref<1x1x16x16xf32, #tpu.memory_space<vmem>>, vector<1x1x16x16xf32>,
    return
  }
  func.func @transform_0(%arg0: i32, %arg1: i32) -> (i32, i32, i32, i32) {
    %c0_i32 = arith.constant 0 : i32
    %c0_i32_0 = arith.constant 0 : i32
    %c0_i32_1 = arith.constant 0 : i32
    return %arg0, %c0_i32, %arg1, %c0_i32_0 : i32, i32, i32, i32
  }
  func.func @transform_1(%arg0: i32, %arg1: i32) -> (i32, i32, i32, i32) {
    %c2_i32 = arith.constant 2 : i32
    %0 = arith.muli %arg1, %c2_i32 : i32
    %c1_i32 = arith.constant 1 : i32
    %1 = arith.subi %0, %c1_i32 : i32
    %c0_i32 = arith.constant 0 : i32
    %2 = arith.maxsi %1, %c0_i32 : i32
    %c0_i32_0 = arith.constant 0 : i32
    %c0_i32_1 = arith.constant 0 : i32
    %c0_i32_2 = arith.constant 0 : i32
    return %arg0, %c0_i32_0, %2, %c0_i32_1 : i32, i32, i32, i32
  }
  func.func @transform_2(%arg0: i32, %arg1: i32) -> (i32, i32, i32, i32) {
    %c2_i32 = arith.constant 2 : i32
    %0 = arith.muli %arg1, %c2_i32 : i32
    %c2_i32_0 = arith.constant 2 : i32
    %1 = arith.addi %0, %c2_i32_0 : i32
    %c1_i32 = arith.constant 1 : i32
    %2 = arith.minsi %1, %c1_i32 : i32
    %c0_i32 = arith.constant 0 : i32
    %c0_i32_1 = arith.constant 0 : i32
    %c0_i32_2 = arith.constant 0 : i32
    return %arg0, %c0_i32, %2, %c0_i32_1 : i32, i32, i32, i32
  }
  func.func @transform_3(%arg0: i32, %arg1: i32) -> (i32, i32, i32, i32, i32) {
    %c0_i32 = arith.constant 0 : i32
    %c0_i32_0 = arith.constant 0 : i32
    %c0_i32_1 = arith.constant 0 : i32
    %c0_i32_2 = arith.constant 0 : i32
    return %arg0, %c0_i32, %c0_i32_0, %arg1, %c0_i32_1 : i32, i32, i32, i32, i32
  }
  func.func @transform_4(%arg0: i32, %arg1: i32) -> (i32, i32, i32, i32) {
    %c0_i32 = arith.constant 0 : i32
    %c0_i32_0 = arith.constant 0 : i32
    %c0_i32_1 = arith.constant 0 : i32
    return %arg0, %c0_i32, %arg1, %c0_i32_0 : i32, i32, i32, i32
  }
  func.func @transform_5(%arg0: i32, %arg1: i32) -> (i32, i32, i32, i32, i32) {
    %c0_i32 = arith.constant 0 : i32
    %c0_i32_0 = arith.constant 0 : i32
    %c0_i32_1 = arith.constant 0 : i32
    %c0_i32_2 = arith.constant 0 : i32
    return %arg0, %c0_i32, %c0_i32_0, %arg1, %c0_i32_1 : i32, i32, i32, i32, i32
  }
}

</mosaic_0001>

<bundles_post_ra>
// kernel: tpu_custom_call.1
= control target key start
LH: loop header
LB: loop body
LE: loop exit
PB: predicated region body
PF: predicated region fallthrough
CT: control target
= control target key end

     0   :  { %s2323_s0 = inlined_call_operand.hbm [shape: f32[2,4,16,16], index: 0, kind: input, shape index: {}]   ;;  %s2324_s1 = inlined_call_operand.hbm [shape: f32[2,4,16,16], index: 1, kind: input, shape index: {}]   ;;  %s2325_s2 = inlined_call_operand.hbm [shape: f32[2,4,16,16], index: 2, kind: input, shape index: {}]   ;;  %s2326_s3 = inlined_call_operand.hbm [shape: f32[2,4,9,16,16], index: 3, kind: input, shape index: {}]   ;;  %s2327_s4 = inlined_call_operand.hbm [shape: f32[2,1,16,16], index: 4, kind: output, shape index: {0}]   ;;  %s2328_s5 = inlined_call_operand.hbm [shape: f32[2,4,1,16,16], index: 5, kind: output, shape index: {1}]  }
   0x1   :  { %2339 = sst [smem:[#allocation23_spill]] %s2324_s1 }
   0x2   :  { %2340 = sst [smem:[#allocation24_spill]] %s2327_s4 }
   0x3   :  { %11 = vsyncpa [#allocation3], 0 }
   0x4   :  { %13 = vsyncpa [#allocation3 + $0x1], 0 }
   0x5   :  { %14 = vsyncpa [#allocation6], 0 }
   0x6   :  { %16 = vsyncpa [#allocation6 + $0x1], 0 }
   0x7   :  { %17 = vsyncpa [#allocation9], 0 }
   0x8   :  { %19 = vsyncpa [#allocation9 + $0x1], 0 }
   0x9   :  { %20 = vsyncpa [#allocation4], 0 }
   0xa   :  { %22 = vsyncpa [#allocation4 + $0x1], 0 }
   0xb   :  { %23 = vsyncpa [#allocation12], 0 }
   0xc   :  { %25 = vsyncpa [#allocation12 + $0x1], 0  ;;  %s1623_s18 = smov 0   ;;  %s1625_s19 = smov 0  }
   0xd   :  { %s1627_s20 = smov 0   ;;  %s1629_s21 = smov 0  }
   0xe   :  { %s1631_s22 = smov 0   ;;  %s1633_s23 = smov 0  }
   0xf LB: > { %2341 = sst [smem:[#allocation18_spill]] %s1557_s18  ;;  %s1654_s24 = sadd.s32 4294967295, %s1577_s23   ;;  %s1577_s23 = sphi %s1633_s23, %s31_s23   ;;  %s1573_s22 = sphi %s1631_s22, %s2366_s22   ;;  %s1569_s21 = sphi %s1629_s21, %s2365_s21   ;;  %s1565_s20 = sphi %s1627_s20, %s2361_s20   ;;  %s1561_s19 = sphi %s1625_s19, %s2364_s19   ;;  %s1557_s18 = sphi %s1623_s18, %s2363_s18  }
  0x10   : > { %2342 = sst [smem:[#allocation19_spill]] %s1565_s20  ;;  %s1220_s25 = sadd.s32 4294967294, %s1577_s23  }
  0x11   : > { %s43_s26 = sadd.s32 1, %s1573_s22  ;;  %s52_s27 = sadd.s32 1, %s1565_s20 }
  0x12   : > { %p45_p0 = scmp.ge.s32.totalorder %s43_s26, 2  ;;  %p59_p1 = scmp.ne.s32.totalorder %s1565_s20, %s1561_s19 }
  0x13   : > { %p60_p2 = scmp.eq.s32.totalorder %s1577_s23, 0  ;;  %p65_p3 = scmp.ne.s32.totalorder %s1561_s19, %s1557_s18 }
  0x14   : > { %s2368_s26 = smov (%p45_p0, %s43_s26), 0  ;;  %p66_p5 = scmp.eq.s32.totalorder %s1654_s24, 0 }
  0x15   : > { %2343 = sst [smem:[#allocation20_spill]] %s2368_s26  ;;  %p1666_p4 = por %p60_p2, %p59_p1 }
  0x16   : > { %s47_s29 = ssub.s32 %s1573_s22, %s2368_s26  ;;  %p191_p6 = scmp.eq.s32.totalorder %s1654_s24, 1 }
  0x17   : > { %p50_p7 = scmp.eq.s32.totalorder %s47_s29, 0  ;;  %p1674_p8 = por %p66_p5, %p65_p3 }
  0x18   : > { %p1678_p9 = por %p191_p6, %p59_p1  ;;  %p197_p10 = scmp.eq.s32.totalorder %s1220_s25, 1 }
  0x19   : > { %s1683_s7 = scalar_select %p50_p7, %s1565_s20, %s52_s27  }
  0x1a   : > { %p1685_p11 = por %p197_p10, %p65_p3  ;;  %p1289_p13 = scmp.lt.s32.totalorder %s1577_s23, 2 }
  0x1b   : > { %2347 = sst [smem:[#allocation21_spill]] %s1683_s7  ;;  %s1692_s9 = sand.u32 1, %s1565_s20  }
  0x1c   : > { %s2348_s8 = scalar_select %p1685_p11, 1, 0 }
  0x1d   : > { %s1695_s10 = sshll.u32 %s1573_s22, 10  ;;  %p1699_p0 = pnand %p1289_p13, %p1666_p4 }
  0x1e   : > { %2349 = sst [smem:[#allocation22_spill]] %s2348_s8  ;;  %s268_s12 = sand.u32 1, %s1577_s23  }
  0x1f   : > { %s1226_s13 = sshll.u32 %s1692_s9, 5  ;;  %s2351_s1 = sld [smem:[#allocation23_spill]] }
  0x20   : > { %s272_s17 = scalar_lea.vmem [#allocation5], %s1226_s13  ;;  %s1709_s27 = scalar_lea.sflag [#allocation6], %s268_s12 }
  0x21   : > { %s284_s25 = sshll.u32 %s272_s17, 4  ;;  %p1349_p1 = pneg %p1699_p0  ;;  %s285_s25 = int_to_ptr.vmem [resolvable:$true] %s284_s25 }
  0x22   : > { %s1360_s28 = scalar_lea.vmem %s285_s25, 512  ;;  %s1579_s29 = smov [#allocation5]  }
  0x23   : > { %p1361_p2 = scmp.ne.s32.totalorder %s285_s25, %s1360_s28  ;;  %s1365_s26 = sshll.u32 %s1579_s29, 4  ;;  %s1366_s26 = int_to_ptr.vmem [resolvable:$false] %s1365_s26 }
  0x24   : > { %s1367_s7 = scalar_lea.vmem %s1366_s26, 1024  ;;  %p1368_p5 = scmp.lt.s32.totalorder %s285_s25, %s1366_s26 }
  0x25   : > { %s283_s16 = scalar_lea.hbm %s2351_s1, %s1695_s10  ;;  %p1363_p3 = pnand %p1361_p2, %p1349_p1 }
  0x26   : > { %p1369_p6 = scmp.lt.s32.totalorder %s1367_s7, %s1360_s28 }
  0x27   : > { %p1364_p4 = pneg %p1363_p3 }
  0x28   : > { %p1370_p7 = por %p1369_p6, %p1368_p5 }
  0x2a   : > { %p1371_p10 = pnand %p1370_p7, %p1364_p4 }
  0x2c   : > { %1374 = shalt.err (!%p1371_p10)
}
  0x2d   : > { %s2334_s14 = smov 256   ;;  %s2335_s12 = smov 128  }
  0x2e   : > { %s2337_s15 = smov 8   ;;  %s298_s26 = scalar_lea.vmem [#allocation7], %s1226_s13 }
  0x2f   : > { %1275 = dma.hbm_to_vmem [thread:$0]  (!%p1699_p0), %s283_s16, 512, %s285_s25, %s1709_s27, %s2334_s14, %s2335_s12, %s2337_s15  }
  0x30   : > { %s310_s7 = sshll.u32 %s298_s26, 4  ;;  %p1233_p13 = scmp.ge.s32.totalorder %s1577_s23, 1  ;;  %s1723_s7 = int_to_ptr.vmem [resolvable:$true] %s310_s7 }
  0x31   : > { %p341_p2 = scmp.lt.s32.totalorder %s1577_s23, 3  ;;  %s1223_s28 = sshll.u32 %s1692_s9, 6 }
  0x32   : > { %s257_s20 = scalar_lea.hbm %s2323_s0, %s1695_s10  ;;  %s1250_s8 = sadd.s32 128, %s1695_s10 }
  0x33   : > { %p1726_p3 = pnand %p1233_p13, %p341_p2  ;;  %s249_s18 = scalar_lea.vmem [#allocation2], %s1223_s28 }
  0x34   : > { %s258_s4 = sshll.u32 %s249_s18, 4  ;;  %s1739_s25 = scalar_lea.hbm %s2325_s2, %s1250_s8  ;;  %s259_s4 = int_to_ptr.vmem [resolvable:$true] %s258_s4 }
  0x35   : > { %s246_s26 = scalar_lea.sflag [#allocation3], %s1692_s9  ;;  %s1388_s14 = scalar_lea.vmem %s259_s4, 1024 }
  0x36   : > { %p1389_p4 = scmp.ne.s32.totalorder %s259_s4, %s1388_s14  ;;  %s1583_s12 = smov [#allocation2]  }
  0x37   : > { %s1393_s15 = sshll.u32 %s1583_s12, 4  ;;  %s1394_s15 = int_to_ptr.vmem [resolvable:$false] %s1393_s15 }
  0x38   : > { %p1391_p5 = pnand %p1389_p4, %p1349_p1  ;;  %s1395_s1 = scalar_lea.vmem %s1394_s15, 2048 }
  0x39   : > { %p1396_p7 = scmp.lt.s32.totalorder %s259_s4, %s1394_s15  ;;  %p1397_p10 = scmp.lt.s32.totalorder %s1395_s1, %s1388_s14 }
  0x3a   : > { %p1392_p6 = pneg %p1391_p5 }
  0x3b   : > { %p1398_p13 = por %p1397_p10, %p1396_p7 }
  0x3d   : > { %p1399_p2 = pnand %p1398_p13, %p1392_p6 }
  0x3f   : > { %1402 = shalt.err (!%p1399_p2)
}
  0x40   : > { %s2353_s18 = smov 8   ;;  %s2354_s8 = smov 128  }
  0x41   : > { %1272 = dma.hbm_to_vmem [thread:$0]  (!%p1699_p0), %s257_s20, 1024, %s259_s4, %s246_s26, %s2354_s8, %s2354_s8, %s2353_s18  }
  0x42   : > { %s1416_s10 = scalar_lea.vmem %s1723_s7, 512  ;;  %s1584_s14 = smov [#allocation7]  }
  0x43   : > { %p1417_p4 = scmp.ne.s32.totalorder %s1723_s7, %s1416_s10  ;;  %s1421_s12 = sshll.u32 %s1584_s14, 4  ;;  %s1422_s12 = int_to_ptr.vmem [resolvable:$false] %s1421_s12 }
  0x44   : > { %s1423_s15 = scalar_lea.vmem %s1422_s12, 1024  ;;  %p1424_p6 = scmp.lt.s32.totalorder %s1723_s7, %s1422_s12 }
  0x45   : > { %p1419_p5 = pnand %p1417_p4, %p1349_p1  ;;  %p1425_p7 = scmp.lt.s32.totalorder %s1423_s15, %s1416_s10 }
  0x47   : > { %p1420_p12 = pneg %p1419_p5  ;;  %p1426_p10 = por %p1425_p7, %p1424_p6 }
  0x49   : > { %p1427_p13 = pnand %p1426_p10, %p1420_p12 }
  0x4b   : > { %1430 = shalt.err (!%p1427_p13)
}
  0x4c   : > { %s2355_s4 = smov 256   ;;  %s1254_s20 = smul.u32 576, %s1692_s9 }
  0x4d   : > { %1278 = dma.hbm_to_vmem [thread:$0]  (!%p1699_p0), %s1739_s25, 512, %s1723_s7, %s1709_s27, %s2355_s4, %s2354_s8, %s2353_s18  }
  0x4e   : > { %s1255_s28 = smul.u32 9216, %s1573_s22  ;;  %s324_s26 = scalar_lea.vmem [#allocation8], %s1254_s20 }
  0x4f   : > { %s333_s1 = sshll.u32 %s324_s26, 4  ;;  %s321_s10 = scalar_lea.sflag [#allocation9], %s1692_s9  ;;  %s334_s1 = int_to_ptr.vmem [resolvable:$true] %s333_s1 }
  0x50   : > { %s332_s13 = scalar_lea.hbm %s2326_s3, %s1255_s28  ;;  %s1444_s14 = scalar_lea.vmem %s334_s1, 9216 }
  0x51   : > { %p1445_p12 = scmp.ne.s32.totalorder %s334_s1, %s1444_s14  ;;  %s1585_s12 = smov [#allocation8]  }
  0x52   : > { %s1449_s15 = sshll.u32 %s1585_s12, 4  ;;  %s1450_s15 = int_to_ptr.vmem [resolvable:$false] %s1449_s15 }
  0x53   : > { %p1447_p2 = pnand %p1445_p12, %p1349_p1  ;;  %s1451_s27 = scalar_lea.vmem %s1450_s15, 18432 }
  0x54   : > { %p1452_p5 = scmp.lt.s32.totalorder %s334_s1, %s1450_s15  ;;  %p1453_p6 = scmp.lt.s32.totalorder %s1451_s27, %s1444_s14 }
  0x55   : > { %p1448_p4 = pneg %p1447_p2 }
  0x56   : > { %p1454_p7 = por %p1453_p6, %p1452_p5 }
  0x58   : > { %p1455_p10 = pnand %p1454_p7, %p1448_p4 }
  0x5a   : > { %1458 = shalt.err (!%p1455_p10)
}
  0x5b   : > { %1281 = dma.hbm_to_vmem [thread:$0]  (!%p1699_p0), %s332_s13, 9216, %s334_s1, %s321_s10, %s2354_s8, %s2354_s8, %s2353_s18  }
  0x5c   : > { %345 = sbr.rel (%p1726_p3) target bundleno = 362 (0x16a), region = 36  ;;  %s1781_s9 = sand.u32 (!%p1726_p3), 1, %s1561_s19  }
  0x5d   : > { %s1234_s7 = sshll.u32 (!%p1726_p3), %s1781_s9, 6  ;;  %s348_s25 = scalar_lea.sflag (!%p1726_p3), [#allocation3], %s1781_s9 }
  0x5e   : > { %s1787_s4 = scalar_lea.vmem (!%p1726_p3), [#allocation2], %s1234_s7 }
  0x61   : > { %1536 = dma.done.wait (%p1674_p8), %s348_s25, 1024  }
  0x62   : > { %1538 = vsyncadd (%p1674_p8), %s348_s25, 4294966272  ;;  %s356_s11 = sand.u32 1, %s1654_s24  }
  0x63   : > { %s357_s17 = scalar_lea.sflag [#allocation6], %s356_s11 }
  0x64   : > { %1540 = dma.done.wait (%p1674_p8), %s357_s17, 1024  }
  0x65   : > { %1542 = vsyncadd (%p1674_p8), %s357_s17, 4294966272  ;;  %s1256_s18 = smul.u32 576, %s1781_s9  ;;  %s375_s8 = scalar_lea.sflag [#allocation9], %s1781_s9 }
  0x67   : > { %s1800_s20 = scalar_lea.vmem [#allocation8], %s1256_s18 }
  0x68   : > { %1544 = dma.done.wait (%p1674_p8), %s375_s8, 9216  }
  0x69   : > { %1546 = vsyncadd (%p1674_p8), %s375_s8, 4294958080  ;;  %v1807_v0 = vld [vmem:[%s1787_s4 + $0x10] sm:$0xff]  ;;  %vm549_vm0 = vcmask 1040384   ;;  %v1810_v1 = vld [vmem:[%s1787_s4] sm:$0xff]  ;;  %s1586_s24 = smov 1   ;;  %vm574_vm1 = vcmask 1046528  }
  0x6a   : > { %v553_v2 = vrot.slane %v1807_v0, 7  ;;  %v550_v3 = vrot.slane %v1810_v1, 7  ;;  %v1815_v4 = vld [vmem:[%s1787_s4 + $0x18] sm:$0xff]  ;;  %v1819_v6 = vld [vmem:[%s1787_s4 + $0x8] sm:$0xff]  ;;  %v1822_v7 = vld [vmem:[%s1787_s4 + $0x20] sm:$0xff]  ;;  %s1587_s30 = smov 127  }
  0x6b   : > { %v554_v5 = vrot.slane %v1815_v4, 7  ;;  %v551_v10 = vrot.slane %v1819_v6, 7  ;;  %v1832_v11 = vld [vmem:[%s1787_s4 + $0x28] sm:$0xff]  ;;  %v556_v14 = vrot.slane %v1822_v7, 7  ;;  %v581_v19 = vrot.slane %v1822_v7, 1  ;;  %v1866_v21 = vld [vmem:[%s1787_s4 + $0x30] sm:$0xff] }
  0x6c   : > { %v1825_v8 = vsel %vm549_vm0, 0.0, %v553_v2  ;;  %v1828_v9 = vsel %vm549_vm0, 0.0, %v550_v3  ;;  %v557_v15 = vrot.slane %v1832_v11, 7  ;;  %v582_v18 = vrot.slane %v1832_v11, 1  ;;  %v1869_v22 = vld [vmem:[%s1787_s4 + $0x38] sm:$0xff]  ;;  %v465_v42 = vld [vmem:[%s1800_s20 + $0xa0] sm:$0xff] }
  0x6d   : > { %619 = vrot.lane.b32.xlu1 %v1825_v8, %s1586_s24  ;;  %615 = vrot.lane.b32.xlu0 %v1828_v9, %s1586_s24  ;;  %v1839_v12 = vsel %vm549_vm0, %v553_v2, %v554_v5  ;;  %v1842_v13 = vsel %vm549_vm0, %v550_v3, %v551_v10  ;;  %v1854_v17 = vsel %vm549_vm0, 0.0, %v556_v14  ;;  %v559_v23 = vrot.slane %v1866_v21, 7  ;;  %v447_v43 = vld [vmem:[%s1800_s20 + $0x10] sm:$0xff]  ;;  %v445_v45 = vld [vmem:[%s1800_s20] sm:$0xff]  ;;  %s2181_s28 = scalar_lea.vmem [#allocation11], %s1234_s7  ;;  %s1237_s29 = sshll.u32 %s1781_s9, 4 }
  0x6e   : > { %v1851_v16 = vsel %vm549_vm0, %v556_v14, %v557_v15  ;;  %v1863_v20 = vsel %vm574_vm1, %v581_v19, %v582_v18  ;;  %v560_v24 = vrot.slane %v1869_v22, 7  ;;  %v576_v27 = vrot.slane %v1819_v6, 1  ;;  %v463_v44 = vld [vmem:[%s1800_s20 + $0x90] sm:$0xff]  ;;  %v466_v50 = vld [vmem:[%s1800_s20 + $0xa8] sm:$0xff]  ;;  %v464_v55 = vld [vmem:[%s1800_s20 + $0x98] sm:$0xff]  ;;  %s1252_s16 = sshll.u32 %s1569_s21, 10 }
  0x6f   : > { %v1885_v26 = vsel %vm549_vm0, 0.0, %v559_v23  ;;  %v1588_v28 = vmov 0.0   ;;  %v575_v30 = vrot.slane %v1810_v1, 1  ;;  %v579_v33 = vrot.slane %v1815_v4, 1  ;;  %v484_v61 = vld [vmem:[%s1800_s20 + $0x138] sm:$0xff]  ;;  %v483_v62 = vld [vmem:[%s1800_s20 + $0x130] sm:$0xff]  ;;  %s2219_s10 = scalar_lea.hbm %s2328_s5, %s1252_s16 }
  0x70   : > { %v1882_v25 = vsel %vm549_vm0, %v559_v23, %v560_v24  ;;  %v599_v29 = vrot.slane %v1588_v28, 1  ;;  %v578_v34 = vrot.slane %v1807_v0, 1  ;;  %v585_v38 = vrot.slane %v1869_v22, 1  ;;  %v482_v3 = vld [vmem:[%s1800_s20 + $0x128] sm:$0xff]  ;;  %v481_v5 = vld [vmem:[%s1800_s20 + $0x120] sm:$0xff]  ;;  %s1024_s13 = sshll.u32 %s2181_s28, 4  ;;  %s2221_s13 = int_to_ptr.vmem [resolvable:$true] %s1024_s13 }
  0x71   : > { %621 = vrot.lane.b32.xlu1 %v1839_v12, %s1586_s24  ;;  %617 = vrot.lane.b32.xlu0 %v1842_v13, %s1586_s24  ;;  %v1933_v32 = vsel %vm574_vm1, %v575_v30, %v576_v27  ;;  %v584_v39 = vrot.slane %v1866_v21, 1  ;;  %vm639_vm2 = vcmask 7168   ;;  %v666_v46 = vmul.f32 %v1825_v8, %v465_v42  ;;  %v450_v42 = vld [vmem:[%s1800_s20 + $0x28] sm:$0xff]  ;;  %s1251_s14 = sshll.u32 %s1569_s21, 8  ;;  %s2232_s12 = scalar_lea.vmem [#allocation10], %s1237_s29 }
  0x72   : > { %v1930_v31 = vsel %vm574_vm1, %v576_v27, %v599_v29  ;;  %v1942_v35 = vsel %vm574_vm1, %v579_v33, %v599_v29  ;;  %v1945_v36 = vsel %vm574_vm1, %v578_v34, %v579_v33  ;;  %v1956_v37 = vsel %vm574_vm1, %v582_v18, %v599_v29  ;;  %v448_v34 = vld [vmem:[%s1800_s20 + $0x18] sm:$0xff]  ;;  %s1006_s15 = sshll.u32 %s2232_s12, 4  ;;  %s991_s27 = scalar_lea.sflag [#allocation12], %s1781_s9  ;;  %s2270_s15 = int_to_ptr.vmem [resolvable:$true] %s1006_s15 }
  0x73   : > { %v1965_v40 = vsel %vm574_vm1, %v585_v38, %v599_v29  ;;  %v1968_v41 = vsel %vm574_vm1, %v584_v39, %v585_v38  ;;  %v664_v47 = vmul.f32 %v1828_v9, %v447_v43  ;;  %v667_v56 = vmul.f32 %v1839_v12, %v466_v50  ;;  %v446_v38 = vld [vmem:[%s1800_s20 + $0x8] sm:$0xff]  ;;  %s1459_s7 = scalar_lea.vmem %s2221_s13, 1024  ;;  %s1589_s25 = smov [#allocation11]  }
  0x74   : > { %vm704_vm3 = vcmask 121856   ;;  %v454_v50 = vld [vmem:[%s1800_s20 + $0x48] sm:$0xff]  ;;  %vm957_vm4 = vcmask 130048   ;;  %p1460_p8 = scmp.ne.s32.totalorder %s2221_s13, %s1459_s7  ;;  %s1463_s4 = sshll.u32 %s1589_s25, 4  ;;  %s1464_s4 = int_to_ptr.vmem [resolvable:$false] %s1463_s4 }
  0x75   : > { %625 = vrot.lane.b32.xlu1 %v1851_v16, %s1586_s24  ;;  %623 = vrot.lane.b32.xlu0 %v1854_v17, %s1586_s24  ;;  %s1465_s11 = scalar_lea.vmem %s1464_s4, 2048  ;;  %p1466_p3 = scmp.lt.s32.totalorder %s2221_s13, %s1464_s4 }
  0x76   : > { %p1461_p0 = pnand %p1460_p8, %p1678_p9  ;;  %p1467_p13 = scmp.lt.s32.totalorder %s1465_s11, %s1459_s7 }
  0x78   : > { %p1462_p1 = pneg %p1461_p0  ;;  %p1468_p12 = por %p1467_p13, %p1466_p3 }
  0x79   : > { %682 = vrot.lane.b32.xlu1 %v1842_v13, %s1587_s30  ;;  %680 = vrot.lane.b32.xlu0 %v1828_v9, %s1587_s30  ;;  %v668_v9 = vmul.f32 %v1854_v17, %v483_v62 }
  0x7a   : > { %p1469_p2 = pnand %p1468_p12, %p1462_p1 }
  0x7d   : > { %686 = vrot.lane.b32.xlu1 %v1839_v12, %s1587_s30  ;;  %684 = vrot.lane.b32.xlu0 %v1825_v8, %s1587_s30  ;;  %v669_v8 = vmul.f32 %v1851_v16, %v484_v61  ;;  %v451_v61 = vld [vmem:[%s1800_s20 + $0x30] sm:$0xff] }
  0x81   : > { %629 = vrot.lane.b32.xlu1 %v1882_v25, %s1586_s24  ;;  %627 = vrot.lane.b32.xlu0 %v1885_v26, %s1586_s24 }
  0x85   : > { %690 = vrot.lane.b32.xlu1 %v1851_v16, %s1587_s30  ;;  %688 = vrot.lane.b32.xlu0 %v1854_v17, %s1587_s30 }
  0x89   : > { %731 = vrot.lane.b32.xlu1 %v1819_v6, %s1586_s24  ;;  %729 = vrot.lane.b32.xlu0 %v1810_v1, %s1586_s24 }
  0x8d   : > { %735 = vrot.lane.b32.xlu1 %v1815_v4, %s1586_s24  ;;  %733 = vrot.lane.b32.xlu0 %v1807_v0, %s1586_s24 }
  0x91   : > { %694 = vrot.lane.b32.xlu1 %v1882_v25, %s1587_s30  ;;  %692 = vrot.lane.b32.xlu0 %v1885_v26, %s1587_s30 }
  0x95   : > { %739 = vrot.lane.b32.xlu1 %v1832_v11, %s1586_s24  ;;  %737 = vrot.lane.b32.xlu0 %v1822_v7, %s1586_s24 }
  0x99   : > { %743 = vrot.lane.b32.xlu1 %v1869_v22, %s1586_s24  ;;  %741 = vrot.lane.b32.xlu0 %v1866_v21, %s1586_s24 }
  0x9d   : > { %795 = vrot.lane.b32.xlu1 %v1819_v6, %s1587_s30  ;;  %793 = vrot.lane.b32.xlu0 %v1810_v1, %s1587_s30 }
  0xa1   : > { %799 = vrot.lane.b32.xlu1 %v1815_v4, %s1587_s30  ;;  %797 = vrot.lane.b32.xlu0 %v1807_v0, %s1587_s30 }
  0xa5   : > { %803 = vrot.lane.b32.xlu1 %v1832_v11, %s1587_s30  ;;  %801 = vrot.lane.b32.xlu0 %v1822_v7, %s1587_s30 }
  0xa9   : > { %847 = vrot.lane.b32.xlu1 %v1930_v31, %s1586_s24  ;;  %845 = vrot.lane.b32.xlu0 %v1933_v32, %s1586_s24 }
  0xad   : > { %851 = vrot.lane.b32.xlu1 %v1942_v35, %s1586_s24  ;;  %849 = vrot.lane.b32.xlu0 %v1945_v36, %s1586_s24 }
  0xb1   : > { %807 = vrot.lane.b32.xlu1 %v1869_v22, %s1587_s30  ;;  %805 = vrot.lane.b32.xlu0 %v1866_v21, %s1587_s30 }
  0xb5   : > { %855 = vrot.lane.b32.xlu1 %v1956_v37, %s1586_s24  ;;  %853 = vrot.lane.b32.xlu0 %v1863_v20, %s1586_s24 }
  0xb9   : > { %859 = vrot.lane.b32.xlu1 %v1965_v40, %s1586_s24  ;;  %857 = vrot.lane.b32.xlu0 %v1968_v41, %s1586_s24 }
  0xbd   : > { %911 = vrot.lane.b32.xlu1 %v1930_v31, %s1587_s30  ;;  %909 = vrot.lane.b32.xlu0 %v1933_v32, %s1587_s30 }
  0xc1   : > { %915 = vrot.lane.b32.xlu1 %v1942_v35, %s1587_s30  ;;  %913 = vrot.lane.b32.xlu0 %v1945_v36, %s1587_s30 }
  0xc5   : > { %919 = vrot.lane.b32.xlu1 %v1956_v37, %s1587_s30  ;;  %917 = vrot.lane.b32.xlu0 %v1863_v20, %s1587_s30 }
  0xc9   : > { %923 = vrot.lane.b32.xlu1 %v1965_v40, %s1587_s30  ;;  %921 = vrot.lane.b32.xlu0 %v1968_v41, %s1587_s30 }
  0xdf   : > { %v620_v48 = vpop.permute.xlu1 %619  ;;  %v616_v49 = vpop.permute.xlu0 %615 }
  0xe0   : > { %v642_v51 = vsel %vm639_vm2, 0.0, %v620_v48  ;;  %v640_v52 = vsel %vm639_vm2, 0.0, %v616_v49 }
  0xe1   : > { %v650_v53 = vmul.f32 %v642_v51, %v463_v44  ;;  %v648_v54 = vmul.f32 %v640_v52, %v445_v45  ;;  %v449_v44 = vld [vmem:[%s1800_s20 + $0x20] sm:$0xff] }
  0xe2   : > { %v453_v51 = vld [vmem:[%s1800_s20 + $0x40] sm:$0xff] }
  0xe3   : > { %v2001_v57 = vadd.f32 %v666_v46, %v650_v53  ;;  %v672_v58 = vadd.f32 %v664_v47, %v648_v54  ;;  %v622_v59 = vpop.permute.xlu1 %621  ;;  %v618_v60 = vpop.permute.xlu0 %617  ;;  %v665_v46 = vmul.f32 %v1842_v13, %v448_v34  ;;  %v468_v54 = vld [vmem:[%s1800_s20 + $0xb8] sm:$0xff] }
  0xe4   : > { %v643_v63 = vsel %vm639_vm2, 0.0, %v622_v59  ;;  %v641_v39 = vsel %vm639_vm2, 0.0, %v618_v60  ;;  %v452_v60 = vld [vmem:[%s1800_s20 + $0x38] sm:$0xff] }
  0xe5   : > { %v651_v2 = vmul.f32 %v643_v63, %v464_v55  ;;  %v649_v47 = vmul.f32 %v641_v39, %v446_v38 }
  0xe7   : > { %v675_v10 = vadd.f32 %v667_v56, %v651_v2  ;;  %v626_v14 = vpop.permute.xlu1 %625  ;;  %v624_v12 = vpop.permute.xlu0 %623  ;;  %v467_v56 = vld [vmem:[%s1800_s20 + $0xb0] sm:$0xff]  ;;  %v673_v62 = vadd.f32 %v665_v46, %v649_v47  ;;  %v778_v2 = vmul.f32 %v454_v50, %v1819_v6 }
  0xe8   : > { %v645_v15 = vsel %vm639_vm2, 0.0, %v626_v14  ;;  %v644_v18 = vsel %vm639_vm2, 0.0, %v624_v12  ;;  %v472_v12 = vld [vmem:[%s1800_s20 + $0xd8] sm:$0xff] }
  0xe9   : > { %v653_v19 = vmul.f32 %v645_v15, %v482_v3  ;;  %v652_v23 = vmul.f32 %v644_v18, %v481_v5  ;;  %v777_v3 = vmul.f32 %v453_v51, %v1810_v1  ;;  %v471_v15 = vld [vmem:[%s1800_s20 + $0xd0] sm:$0xff]  ;;  %v780_v38 = vmul.f32 %v472_v12, %v1815_v4  ;;  %v486_v4 = vld [vmem:[%s1800_s20 + $0x148] sm:$0xff] }
  0xea   : > { %v779_v39 = vmul.f32 %v471_v15, %v1807_v0 }
  0xeb   : > { %v2012_v24 = vadd.f32 %v669_v8, %v653_v19  ;;  %v2014_v27 = vadd.f32 %v668_v9, %v652_v23  ;;  %v683_v16 = vpop.permute.xlu1 %682  ;;  %v681_v28 = vpop.permute.xlu0 %680 }
  0xec   : > { %v706_v43 = vsel %vm704_vm3, %v683_v16, 0.0  ;;  %v705_v45 = vsel %vm704_vm3, %v681_v28, 0.0  ;;  %v470_v28 = vld [vmem:[%s1800_s20 + $0xc8] sm:$0xff] }
  0xed   : > { %v714_v52 = vmul.f32 %v706_v43, %v450_v42  ;;  %v713_v53 = vmul.f32 %v705_v45, %v449_v44 }
  0xef   : > { %v687_v17 = vpop.permute.xlu1 %686  ;;  %v685_v29 = vpop.permute.xlu0 %684  ;;  %v722_v18 = vadd.f32 %v714_v52, %v673_v62  ;;  %v721_v19 = vadd.f32 %v713_v53, %v672_v58  ;;  %v489_v62 = vld [vmem:[%s1800_s20 + $0x160] sm:$0xff] }
  0xf0   : > { %v708_v55 = vsel %vm704_vm3, %v687_v17, 0.0  ;;  %v707_v59 = vsel %vm704_vm3, %v685_v29, 0.0  ;;  %v469_v17 = vld [vmem:[%s1800_s20 + $0xc0] sm:$0xff] }
  0xf1   : > { %v716_v5 = vmul.f32 %v708_v55, %v468_v54  ;;  %v715_v8 = vmul.f32 %v707_v59, %v467_v56 }
  0xf3   : > { %v2016_v30 = vpop.permute.xlu1 %629  ;;  %v2018_v33 = vpop.permute.xlu0 %627  ;;  %v724_v42 = vadd.f32 %v716_v5, %v675_v10  ;;  %v723_v43 = vadd.f32 %v715_v8, %v2001_v57  ;;  %v485_v10 = vld [vmem:[%s1800_s20 + $0x140] sm:$0xff]  ;;  %v781_v8 = vmul.f32 %v489_v62, %v1822_v7 }
  0xf7   : > { %v691_v48 = vpop.permute.xlu1 %690  ;;  %v689_v49 = vpop.permute.xlu0 %688 }
  0xf8   : > { %v710_v0 = vsel %vm704_vm3, %v691_v48, 0.0  ;;  %v709_v57 = vsel %vm704_vm3, %v689_v49, 0.0 }
  0xf9   : > { %v718_v55 = vmul.f32 %v710_v0, %v486_v4  ;;  %v717_v56 = vmul.f32 %v709_v57, %v485_v10  ;;  %v495_v10 = vld [vmem:[%s1800_s20 + $0x190] sm:$0xff] }
  0xfb   : > { %v732_v13 = vpop.permute.xlu1 %731  ;;  %v730_v63 = vpop.permute.xlu0 %729 }
  0xfc   : > { %v754_v9 = vsel %vm639_vm2, 0.0, %v732_v13  ;;  %v753_v14 = vsel %vm639_vm2, 0.0, %v730_v63  ;;  %v488_v13 = vld [vmem:[%s1800_s20 + $0x158] sm:$0xff]  ;;  %v487_v63 = vld [vmem:[%s1800_s20 + $0x150] sm:$0xff] }
  0xfd   : > { %v762_v23 = vmul.f32 %v754_v9, %v452_v60  ;;  %v761_v16 = vmul.f32 %v753_v14, %v451_v61  ;;  %v490_v61 = vld [vmem:[%s1800_s20 + $0x168] sm:$0xff]  ;;  %v726_v9 = vadd.f32 %v718_v55, %v2012_v24  ;;  %v725_v14 = vadd.f32 %v717_v56, %v2014_v27 }
  0xfe   : > { %v782_v5 = vmul.f32 %v490_v61, %v1832_v11  ;;  %v500_v61 = vld [vmem:[%s1800_s20 + $0x1b8] sm:$0xff] }
  0xff   : > { %v770_v29 = vadd.f32 %v762_v23, %v722_v18  ;;  %v769_v6 = vadd.f32 %v761_v16, %v721_v19  ;;  %v736_v34 = vpop.permute.xlu1 %735  ;;  %v734_v1 = vpop.permute.xlu0 %733 }
 0x100   : > { %v756_v44 = vsel %vm639_vm2, 0.0, %v736_v34  ;;  %v755_v58 = vsel %vm639_vm2, 0.0, %v734_v1 }
 0x101   : > { %v764_v45 = vmul.f32 %v756_v44, %v470_v28  ;;  %v763_v46 = vmul.f32 %v755_v58, %v469_v17  ;;  %v2049_v47 = vadd.f32 %v778_v2, %v770_v29  ;;  %v2051_v50 = vadd.f32 %v777_v3, %v769_v6  ;;  %v459_v44 = vld [vmem:[%s1800_s20 + $0x70] sm:$0xff]  ;;  %v477_v58 = vld [vmem:[%s1800_s20 + $0x100] sm:$0xff] }
 0x102   : > { %v2095_v56 = vmul.f32 %v1933_v32, %v459_v44  ;;  %v2104_v62 = vmul.f32 %v1945_v36, %v477_v58  ;;  %v503_v36 = vld [vmem:[%s1800_s20 + $0x1d0] sm:$0xff] }
 0x103   : > { %v772_v51 = vadd.f32 %v764_v45, %v724_v42  ;;  %v771_v52 = vadd.f32 %v763_v46, %v723_v43  ;;  %v695_v53 = vpop.permute.xlu1 %694  ;;  %v2057_v54 = vpop.permute.xlu0 %692  ;;  %v478_v42 = vld [vmem:[%s1800_s20 + $0x108] sm:$0xff]  ;;  %v460_v43 = vld [vmem:[%s1800_s20 + $0x78] sm:$0xff]  ;;  %v491_v58 = vld [vmem:[%s1800_s20 + $0x170] sm:$0xff] }
 0x104   : > { %v496_v45 = vld [vmem:[%s1800_s20 + $0x198] sm:$0xff]  ;;  %v2087_v0 = vmul.f32 %v1942_v35, %v478_v42  ;;  %v2092_v55 = vmul.f32 %v1930_v31, %v460_v43  ;;  %v646_v35 = vsel %vm639_vm2, 0.0, %v2018_v33  ;;  %v712_v33 = vsel %vm704_vm3, %v695_v53, 0.0 }
 0x105   : > { %v2059_v59 = vadd.f32 %v780_v38, %v772_v51  ;;  %v2061_v60 = vadd.f32 %v779_v39, %v771_v52  ;;  %v502_v38 = vld [vmem:[%s1800_s20 + $0x1c8] sm:$0xff]  ;;  %v501_v39 = vld [vmem:[%s1800_s20 + $0x1c0] sm:$0xff]  ;;  %v508_v52 = vld [vmem:[%s1800_s20 + $0x1f8] sm:$0xff] }
 0x106   : > { %v671_v46 = vmul.f32 %v1882_v25, %v502_v38  ;;  %v670_v4 = vmul.f32 %v1885_v26, %v501_v39  ;;  %v647_v25 = vsel %vm639_vm2, 0.0, %v2016_v30  ;;  %v499_v26 = vld [vmem:[%s1800_s20 + $0x1b0] sm:$0xff]  ;;  %v456_v31 = vld [vmem:[%s1800_s20 + $0x58] sm:$0xff]  ;;  %v2114_v30 = vmul.f32 %v1863_v20, %v495_v10  ;;  %v457_v20 = vld [vmem:[%s1800_s20 + $0x60] sm:$0xff] }
 0x107   : > { %v740_v2 = vpop.permute.xlu1 %739  ;;  %v738_v48 = vpop.permute.xlu0 %737  ;;  %v474_v39 = vld [vmem:[%s1800_s20 + $0xe8] sm:$0xff]  ;;  %v492_v43 = vld [vmem:[%s1800_s20 + $0x178] sm:$0xff] }
 0x108   : > { %v758_v3 = vsel %vm639_vm2, 0.0, %v740_v2  ;;  %v757_v49 = vsel %vm639_vm2, 0.0, %v738_v48  ;;  %v504_v48 = vld [vmem:[%s1800_s20 + $0x1d8] sm:$0xff] }
 0x109   : > { %v766_v12 = vmul.f32 %v758_v3, %v488_v13  ;;  %v765_v15 = vmul.f32 %v757_v49, %v487_v63  ;;  %v2107_v13 = vmul.f32 %v1956_v37, %v496_v45  ;;  %v455_v63 = vld [vmem:[%s1800_s20 + $0x50] sm:$0xff]  ;;  %v711_v3 = vsel %vm704_vm3, %v2057_v54, 0.0 }
 0x10a   : > { %v2122_v37 = vmul.f32 %v508_v52, %v1869_v22  ;;  %v655_v49 = vmul.f32 %v647_v25, %v500_v61  ;;  %v719_v38 = vmul.f32 %v711_v3, %v503_v36 }
 0x10b   : > { %v774_v18 = vadd.f32 %v766_v12, %v726_v9  ;;  %v773_v19 = vadd.f32 %v765_v15, %v725_v14  ;;  %v744_v23 = vpop.permute.xlu1 %743  ;;  %v742_v16 = vpop.permute.xlu0 %741  ;;  %v506_v15 = vld [vmem:[%s1800_s20 + $0x1e8] sm:$0xff] }
 0x10c   : > { %v760_v54 = vsel %vm639_vm2, 0.0, %v744_v23  ;;  %v759_v22 = vsel %vm639_vm2, 0.0, %v742_v16  ;;  %v679_v10 = vadd.f32 %v671_v46, %v655_v49 }
 0x10d   : > { %v2073_v28 = vadd.f32 %v782_v5, %v774_v18  ;;  %v2075_v7 = vadd.f32 %v781_v8, %v773_v19  ;;  %v654_v5 = vmul.f32 %v646_v35, %v499_v26  ;;  %v458_v8 = vld [vmem:[%s1800_s20 + $0x68] sm:$0xff]  ;;  %v505_v18 = vld [vmem:[%s1800_s20 + $0x1e0] sm:$0xff]  ;;  %v768_v61 = vmul.f32 %v760_v54, %v506_v15 }
 0x10e   : > { %v767_v25 = vmul.f32 %v759_v22, %v505_v18 }
 0x10f   : > { %v796_v11 = vpop.permute.xlu1 %795  ;;  %v794_v24 = vpop.permute.xlu0 %793  ;;  %v678_v52 = vadd.f32 %v670_v4, %v654_v5  ;;  %v494_v5 = vld [vmem:[%s1800_s20 + $0x188] sm:$0xff] }
 0x110   : > { %v818_v32 = vsel %vm704_vm3, %v796_v11, 0.0  ;;  %v817_v2 = vsel %vm704_vm3, %v794_v24, 0.0  ;;  %v720_v24 = vmul.f32 %v712_v33, %v504_v48  ;;  %v507_v48 = vld [vmem:[%s1800_s20 + $0x1f0] sm:$0xff] }
 0x111   : > { %v826_v19 = vmul.f32 %v818_v32, %v456_v31  ;;  %v825_v11 = vmul.f32 %v817_v2, %v455_v63  ;;  %v476_v31 = vld [vmem:[%s1800_s20 + $0xf8] sm:$0xff]  ;;  %v475_v32 = vld [vmem:[%s1800_s20 + $0xf0] sm:$0xff]  ;;  %v727_v36 = vadd.f32 %v719_v38, %v678_v52  ;;  %v783_v54 = vmul.f32 %v507_v48, %v1866_v21  ;;  %v462_v21 = vld [vmem:[%s1800_s20 + $0x88] sm:$0xff] }
 0x112   : > { %v728_v33 = vadd.f32 %v720_v24, %v679_v10  ;;  %v510_v24 = vld [vmem:[%s1800_s20 + $0x208] sm:$0xff] }
 0x113   : > { %v800_v27 = vpop.permute.xlu1 %799  ;;  %v798_v17 = vpop.permute.xlu0 %797  ;;  %v833_v35 = vadd.f32 %v825_v11, %v2051_v50  ;;  %v775_v15 = vadd.f32 %v767_v25, %v727_v36 }
 0x114   : > { %v819_v42 = vsel %vm704_vm3, %v798_v17, 0.0  ;;  %v834_v17 = vadd.f32 %v826_v19, %v2049_v47 }
 0x117   : > { %v804_v29 = vpop.permute.xlu1 %803  ;;  %v802_v6 = vpop.permute.xlu0 %801 }
 0x118   : > { %v822_v44 = vsel %vm704_vm3, %v804_v29, 0.0  ;;  %v821_v23 = vsel %vm704_vm3, %v802_v6, 0.0 }
 0x119   : > { %v830_v2 = vmul.f32 %v822_v44, %v492_v43  ;;  %v829_v4 = vmul.f32 %v821_v23, %v491_v58  ;;  %v461_v43 = vld [vmem:[%s1800_s20 + $0x80] sm:$0xff]  ;;  %v512_v23 = vld [vmem:[%s1800_s20 + $0x218] sm:$0xff] }
 0x11b   : > { %v848_v34 = vpop.permute.xlu1 %847  ;;  %v846_v1 = vpop.permute.xlu0 %845  ;;  %v838_v19 = vadd.f32 %v830_v2, %v2073_v28  ;;  %v837_v11 = vadd.f32 %v829_v4, %v2075_v7 }
 0x11c   : > { %v870_v9 = vsel %vm639_vm2, 0.0, %v848_v34  ;;  %v869_v14 = vsel %vm639_vm2, 0.0, %v846_v1  ;;  %v820_v34 = vsel %vm704_vm3, %v800_v27, 0.0  ;;  %v473_v1 = vld [vmem:[%s1800_s20 + $0xe0] sm:$0xff] }
 0x11d   : > { %v878_v45 = vmul.f32 %v870_v9, %v458_v8  ;;  %v877_v16 = vmul.f32 %v869_v14, %v457_v20  ;;  %v828_v63 = vmul.f32 %v820_v34, %v474_v39  ;;  %v827_v46 = vmul.f32 %v819_v42, %v473_v1  ;;  %v493_v8 = vld [vmem:[%s1800_s20 + $0x180] sm:$0xff] }
 0x11e   : > { %v776_v14 = vadd.f32 %v768_v61, %v728_v33  ;;  %v509_v39 = vld [vmem:[%s1800_s20 + $0x200] sm:$0xff] }
 0x11f   : > { %v852_v57 = vpop.permute.xlu1 %851  ;;  %v850_v51 = vpop.permute.xlu0 %849  ;;  %v886_v3 = vadd.f32 %v878_v45, %v834_v17  ;;  %v885_v49 = vadd.f32 %v877_v16, %v833_v35  ;;  %v836_v18 = vadd.f32 %v828_v63, %v2059_v59  ;;  %v835_v22 = vadd.f32 %v827_v46, %v2061_v60  ;;  %v480_v35 = vld [vmem:[%s1800_s20 + $0x118] sm:$0xff] }
 0x120   : > { %v872_v29 = vsel %vm639_vm2, 0.0, %v852_v57  ;;  %v871_v6 = vsel %vm639_vm2, 0.0, %v850_v51 }
 0x121   : > { %v880_v47 = vmul.f32 %v872_v29, %v476_v31  ;;  %v879_v50 = vmul.f32 %v871_v6, %v475_v32  ;;  %v902_v60 = vadd.f32 %v2092_v55, %v886_v3  ;;  %v901_v28 = vadd.f32 %v2095_v56, %v885_v49  ;;  %v479_v31 = vld [vmem:[%s1800_s20 + $0x110] sm:$0xff]  ;;  %v514_v29 = vld [vmem:[%s1800_s20 + $0x228] sm:$0xff]  ;;  %v513_v32 = vld [vmem:[%s1800_s20 + $0x220] sm:$0xff] }
 0x122   : > { %v792_v56 = vadd.f32 %v2122_v37, %v776_v14 }
 0x123   : > { %v808_v12 = vpop.permute.xlu1 %807  ;;  %v806_v53 = vpop.permute.xlu0 %805  ;;  %v888_v44 = vadd.f32 %v880_v47, %v836_v18  ;;  %v887_v59 = vadd.f32 %v879_v50, %v835_v22 }
 0x124   : > { %v824_v38 = vsel %vm704_vm3, %v808_v12, 0.0  ;;  %v823_v34 = vsel %vm704_vm3, %v806_v53, 0.0  ;;  %v511_v53 = vld [vmem:[%s1800_s20 + $0x210] sm:$0xff] }
 0x125   : > { %v832_v52 = vmul.f32 %v824_v38, %v510_v24  ;;  %v831_v61 = vmul.f32 %v823_v34, %v509_v39  ;;  %v904_v33 = vadd.f32 %v2087_v0, %v888_v44  ;;  %v903_v36 = vadd.f32 %v2104_v62, %v887_v59 }
 0x126   : > { %v900_v0 = vmul.f32 %v1965_v40, %v514_v29  ;;  %v899_v62 = vmul.f32 %v1968_v41, %v513_v32 }
 0x127   : > { %v856_v26 = vpop.permute.xlu1 %855  ;;  %v854_v27 = vpop.permute.xlu0 %853  ;;  %v840_v49 = vadd.f32 %v832_v52, %v792_v56 }
 0x128   : > { %v874_v57 = vsel %vm639_vm2, 0.0, %v856_v26  ;;  %v873_v9 = vsel %vm639_vm2, 0.0, %v854_v27  ;;  %v791_v26 = vadd.f32 %v783_v54, %v775_v15 }
 0x129   : > { %v882_v42 = vmul.f32 %v874_v57, %v494_v5  ;;  %v881_v1 = vmul.f32 %v873_v9, %v493_v8  ;;  %v498_v57 = vld [vmem:[%s1800_s20 + $0x1a8] sm:$0xff]  ;;  %v497_v9 = vld [vmem:[%s1800_s20 + $0x1a0] sm:$0xff] }
 0x12a   : > { %v839_v47 = vadd.f32 %v831_v61, %v791_v26 }
 0x12b   : > { %v860_v51 = vpop.permute.xlu1 %859  ;;  %v858_v20 = vpop.permute.xlu0 %857  ;;  %v890_v27 = vadd.f32 %v882_v42, %v838_v19  ;;  %v889_v17 = vadd.f32 %v881_v1, %v837_v11  ;;  %v516_v42 = vld [vmem:[%s1800_s20 + $0x238] sm:$0xff]  ;;  %v515_v1 = vld [vmem:[%s1800_s20 + $0x230] sm:$0xff] }
 0x12c   : > { %v876_v12 = vsel %vm639_vm2, 0.0, %v860_v51  ;;  %v875_v45 = vsel %vm639_vm2, 0.0, %v858_v20 }
 0x12d   : > { %v884_v6 = vmul.f32 %v876_v12, %v512_v23  ;;  %v883_v63 = vmul.f32 %v875_v45, %v511_v53  ;;  %v906_v8 = vadd.f32 %v2107_v13, %v890_v27  ;;  %v905_v51 = vadd.f32 %v2114_v30, %v889_v17 }
 0x12f   : > { %v912_v58 = vpop.permute.xlu1 %911  ;;  %v910_v7 = vpop.permute.xlu0 %909  ;;  %v892_v20 = vadd.f32 %v884_v6, %v840_v49  ;;  %v891_v14 = vadd.f32 %v883_v63, %v839_v47 }
 0x130   : > { %v934_v16 = vsel %vm704_vm3, %v912_v58, 0.0  ;;  %v933_v10 = vsel %vm704_vm3, %v910_v7, 0.0 }
 0x131   : > { %v942_v55 = vmul.f32 %v934_v16, %v462_v21  ;;  %v941_v25 = vmul.f32 %v933_v10, %v461_v43  ;;  %v908_v58 = vadd.f32 %v900_v0, %v892_v20 }
 0x133   : > { %v950_v46 = vadd.f32 %v942_v55, %v902_v60  ;;  %v949_v2 = vadd.f32 %v941_v25, %v901_v28  ;;  %v916_v4 = vpop.permute.xlu1 %915  ;;  %v914_v48 = vpop.permute.xlu0 %913  ;;  %v907_v28 = vadd.f32 %v899_v62, %v891_v14 }
 0x134   : > { %v936_v37 = vsel %vm704_vm3, %v916_v4, 0.0  ;;  %v935_v3 = vsel %vm704_vm3, %v914_v48, 0.0 }
 0x135   : > { %959 = vst.msk [vmem:[%s2181_s28 + $0x8] sm:$0xff] %vm957_vm4, %v950_v46  ;;  %958 = vst.msk [vmem:[%s2181_s28] sm:$0xff] %vm957_vm4, %v949_v2  ;;  %v944_v50 = vmul.f32 %v936_v37, %v480_v35  ;;  %v943_v5 = vmul.f32 %v935_v3, %v479_v31  ;;  %v973_v40 = vsel %vm957_vm4, %v950_v46, 0.0  ;;  %v966_v41 = vsel %vm957_vm4, %v949_v2, 0.0 }
 0x137   : > { %v952_v15 = vadd.f32 %v944_v50, %v904_v33  ;;  %v951_v54 = vadd.f32 %v943_v5, %v903_v36  ;;  %v920_v18 = vpop.permute.xlu1 %919  ;;  %v918_v22 = vpop.permute.xlu0 %917 }
 0x138   : > { %v938_v19 = vsel %vm704_vm3, %v920_v18, 0.0  ;;  %v937_v13 = vsel %vm704_vm3, %v918_v22, 0.0 }
 0x139   : > { %961 = vst.msk [vmem:[%s2181_s28 + $0x18] sm:$0xff] %vm957_vm4, %v952_v15  ;;  %v974_v30 = vsel %vm957_vm4, %v952_v15, 0.0  ;;  %960 = vst.msk [vmem:[%s2181_s28 + $0x10] sm:$0xff] %vm957_vm4, %v951_v54  ;;  %v967_v11 = vsel %vm957_vm4, %v951_v54, 0.0  ;;  %v946_v24 = vmul.f32 %v938_v19, %v498_v57  ;;  %v945_v38 = vmul.f32 %v937_v13, %v497_v9 }
 0x13a   : > { %v975_v39 = vadd.f32 %v974_v30, %v973_v40  ;;  %v968_v34 = vadd.f32 %v967_v11, %v966_v41 }
 0x13b   : > { %v954_v21 = vadd.f32 %v946_v24, %v906_v8  ;;  %v953_v43 = vadd.f32 %v945_v38, %v905_v51  ;;  %v924_v44 = vpop.permute.xlu1 %923  ;;  %v922_v59 = vpop.permute.xlu0 %921 }
 0x13c   : > { %v940_v60 = vsel %vm704_vm3, %v924_v44, 0.0  ;;  %v939_v7 = vsel %vm704_vm3, %v922_v59, 0.0 }
 0x13d   : > { %963 = vst.msk [vmem:[%s2181_s28 + $0x28] sm:$0xff] %vm957_vm4, %v954_v21  ;;  %v976_v23 = vsel %vm957_vm4, %v954_v21, 0.0  ;;  %962 = vst.msk [vmem:[%s2181_s28 + $0x20] sm:$0xff] %vm957_vm4, %v953_v43  ;;  %v969_v12 = vsel %vm957_vm4, %v953_v43, 0.0  ;;  %v948_v53 = vmul.f32 %v940_v60, %v516_v42  ;;  %v947_v45 = vmul.f32 %v939_v7, %v515_v1 }
 0x13e   : > { %v977_v16 = vadd.f32 %v976_v23, %v975_v39  ;;  %v970_v10 = vadd.f32 %v969_v12, %v968_v34 }
 0x13f   : > { %v956_v52 = vadd.f32 %v948_v53, %v908_v58  ;;  %v955_v61 = vadd.f32 %v947_v45, %v907_v28 }
 0x141   : > { %965 = vst.msk [vmem:[%s2181_s28 + $0x38] sm:$0xff] %vm957_vm4, %v956_v52  ;;  %v978_v55 = vsel %vm957_vm4, %v956_v52, 0.0  ;;  %964 = vst.msk [vmem:[%s2181_s28 + $0x30] sm:$0xff] %vm957_vm4, %v955_v61  ;;  %v971_v25 = vsel %vm957_vm4, %v955_v61, 0.0 }
 0x142   : > { %v979_v56 = vadd.f32 %v978_v55, %v977_v16  ;;  %v972_v26 = vadd.f32 %v971_v25, %v970_v10 }
 0x143   : > { %1472 = shalt.err (!%p1469_p2)
}
 0x144   : > { %s1473_s17 = scalar_lea.hbm %s2219_s10, 1024  ;;  %s1477_s20 = scalar_lea.hbm %s2328_s5, 2048 }
 0x145   : > { %p1474_p4 = scmp.ne.s32.totalorder %s2219_s10, %s1473_s17  ;;  %p1478_p7 = scmp.lt.s32.totalorder %s2219_s10, %s2328_s5 }
 0x146   : > { %p1479_p10 = scmp.lt.s32.totalorder %s1477_s20, %s1473_s17 }
 0x147   : > { %p1475_p5 = pnand %p1474_p4, %p1678_p9 }
 0x148   : > { %p1480_p8 = por %p1479_p10, %p1478_p7 }
 0x149   : > { %p1476_p6 = pneg %p1475_p5 }
 0x14b   : > { %p1481_p0 = pnand %p1480_p8, %p1476_p6 }
 0x14d   : > { %1484 = shalt.err (!%p1481_p0)
}
 0x14e   : > { %s1590_s28 = smov 128   ;;  %s1591_s29 = smov 8   ;;  %v982_v27 = vmul.f32 0.25, %v979_v56  ;;  %v981_v17 = vmul.f32 0.25, %v972_v26 }
 0x14f   : > { %1266 = dma.vmem_to_hbm [thread:$0]  (%p1678_p9), %s2221_s13, 1024, %s2219_s10, %s991_s27, %s1590_s28, %s1590_s28, %s1591_s29  }
 0x150   : > { %s2356_s1 = sld [smem:[#allocation24_spill]]  ;;  %984 = vst.msk [vmem:[%s2232_s12 + $0x8] sm:$0xff] %vm957_vm4, %v982_v27  ;;  %983 = vst.msk [vmem:[%s2232_s12] sm:$0xff] %vm957_vm4, %v981_v17  ;;  %s986_s25 = scalar_lea.sflag [#allocation4], %s1781_s9 }
 0x151   : > { %s1485_s13 = scalar_lea.vmem %s2270_s15, 256  ;;  %s1592_s21 = smov [#allocation10]  }
 0x152   : > { %p1486_p1 = scmp.ne.s32.totalorder %s2270_s15, %s1485_s13  ;;  %s1489_s10 = sshll.u32 %s1592_s21, 4  ;;  %s1490_s10 = int_to_ptr.vmem [resolvable:$false] %s1489_s10 }
 0x153   : > { %p1492_p12 = scmp.lt.s32.totalorder %s2270_s15, %s1490_s10 }
 0x154   : > { %p1487_p3 = pnand %p1486_p1, %p1678_p9 }
 0x156   : > { %s2266_s7 = scalar_lea.hbm %s2356_s1, %s1251_s14  ;;  %p1488_p13 = pneg %p1487_p3 }
 0x157   : > { %s1491_s14 = scalar_lea.vmem %s1490_s10, 512 }
 0x158   : > { %p1493_p2 = scmp.lt.s32.totalorder %s1491_s14, %s1485_s13 }
 0x15a   : > { %p1494_p4 = por %p1493_p2, %p1492_p12 }
 0x15c   : > { %p1495_p5 = pnand %p1494_p4, %p1488_p13 }
 0x15e   : > { %1498 = shalt.err (!%p1495_p5)
}
 0x15f   : > { %s1499_s12 = scalar_lea.hbm %s2266_s7, 256  ;;  %s1503_s4 = scalar_lea.hbm %s2356_s1, 512 }
 0x160   : > { %p1500_p6 = scmp.ne.s32.totalorder %s2266_s7, %s1499_s12  ;;  %p1504_p8 = scmp.lt.s32.totalorder %s2266_s7, %s2356_s1 }
 0x161   : > { %p1505_p0 = scmp.lt.s32.totalorder %s1503_s4, %s1499_s12 }
 0x162   : > { %p1501_p7 = pnand %p1500_p6, %p1678_p9 }
 0x163   : > { %p1506_p1 = por %p1505_p0, %p1504_p8 }
 0x164   : > { %p1502_p10 = pneg %p1501_p7 }
 0x166   : > { %p1507_p3 = pnand %p1506_p1, %p1502_p10 }
 0x168   : > { %1510 = shalt.err (!%p1507_p3)
}
 0x169   : > { %1265 = dma.vmem_to_hbm [thread:$0]  (%p1678_p9), %s2270_s15, 256, %s2266_s7, %s986_s25, %s1590_s28, %s1590_s28, %s1591_s29  }
 0x16a PF: > { %s2357_s18 = sld [smem:[#allocation18_spill]]  ;;  %p2359_p13 = scmp.ge.s32.totalorder %s1577_s23, 2 }
 0x16c   : > { %p1283_p12 = pnand %p2359_p13, %p1685_p11 }
 0x16e   : > { %p1284_p2 = pneg %p1283_p12 }
 0x170   : > { %s1039_s20 = sand.u32 1, %s2357_s18  }
 0x171   : > { %s1040_s24 = scalar_lea.sflag [#allocation4], %s1039_s20 }
 0x172   : > { %1548 = dma.done.wait (%p1284_p2), %s1040_s24, 256  }
 0x173   : > { %1550 = vsyncadd (%p1284_p2), %s1040_s24, 4294967040  ;;  %s1049_s30 = scalar_lea.sflag [#allocation12], %s1039_s20 }
 0x174   : > { %1552 = dma.done.wait (%p1284_p2), %s1049_s30, 1024  }
 0x175   : > { %1554 = vsyncadd (%p1284_p2), %s1049_s30, 4294966272  ;;  %s31_s23 = sadd.s32 1, %s1577_s23   ;;  %s2360_s6 = sld [smem:[#allocation19_spill]] }
 0x176   : > { %p28_p4 = scmp.ge.s32.totalorder %s31_s23, 4   ;;  %s2361_s20 = sld [smem:[#allocation21_spill]] }
 0x177   : > { %s2362_s15 = sld [smem:[#allocation20_spill]]  ;;  %s2363_s18 = smov %s1561_s19 }
 0x178   : > { %s2365_s21 = smov %s1573_s22 }
 0x179   :  { %30 = sbr.rel (!%p28_p4) target bundleno = 15 (0xf), region = 135 }
 0x17b   : > { %s2364_s19 = smov %s2360_s6 }
 0x17d   : > { %s2366_s22 = smov %s2362_s15 }
 0x17e   :  { %1054 = vsyncpa [#allocation3], 1 }
 0x17f   :  { %1056 = vsyncpa [#allocation3 + $0x1], 1 }
 0x180   :  { %1057 = vsyncpa [#allocation6], 1 }
 0x181   :  { %1059 = vsyncpa [#allocation6 + $0x1], 1 }
 0x182   :  { %1060 = vsyncpa [#allocation9], 1 }
 0x183   :  { %1062 = vsyncpa [#allocation9 + $0x1], 1 }
 0x184   :  { %1063 = vsyncpa [#allocation4], 1 }
 0x185   :  { %1065 = vsyncpa [#allocation4 + $0x1], 1 }
 0x186   :  { %1066 = vsyncpa [#allocation12], 1 }
 0x187   :  { %1068 = vsyncpa [#allocation12 + $0x1], 1 }

</bundles_post_ra>
